<compile_context>
chip_gen: v7x
topology: tpu7x:2x2x1
jax: 0.10.0
libtpu: 0.0.40
codegen_flags: <defaults>
</compile_context>

<pallas_src>
import functools

import jax
import jax.numpy as jnp
from jax import lax
from jax.experimental import pallas as pl
from jax.experimental.pallas import tpu as pltpu

_LANES = 128
_MAX_TILE_ROWS = 512  # 512 rows * 128 lanes = 64K boxes / tile, 1 MiB per input block


def _fast_recip(x):
    # EUP approx reciprocal (separate bundle slot) + one Newton-Raphson step
    # for ~1e-7 relative error.
    r = pl.reciprocal(x, approx=True)
    return r * (2.0 - x * r)


def _diou_kernel(out_ref, tgt_ref, psum_ref, *, n, tr):
    eps = jnp.float32(1e-7)

    # Coordinate planes, each (tr, 128) — full sublane/lane utilization.
    x1, y1, x2, y2 = out_ref[0], out_ref[1], out_ref[2], out_ref[3]
    x1g, y1g, x2g, y2g = tgt_ref[0], tgt_ref[1], tgt_ref[2], tgt_ref[3]

    # ---- intersection / union (matches torchvision _loss_inter_union) ----
    xkis1 = jnp.maximum(x1, x1g)
    ykis1 = jnp.maximum(y1, y1g)
    xkis2 = jnp.minimum(x2, x2g)
    ykis2 = jnp.minimum(y2, y2g)

    overlap = (ykis2 > ykis1) & (xkis2 > xkis1)
    intsct = jnp.where(overlap, (xkis2 - xkis1) * (ykis2 - ykis1), 0.0)
    union = (x2 - x1) * (y2 - y1) + (x2g - x1g) * (y2g - y1g) - intsct
    iou = intsct * _fast_recip(union + eps)

    # ---- smallest enclosing box diagonal ----
    xc1 = jnp.minimum(x1, x1g)
    yc1 = jnp.minimum(y1, y1g)
    xc2 = jnp.maximum(x2, x2g)
    yc2 = jnp.maximum(y2, y2g)
    diag_sq = (xc2 - xc1) * (xc2 - xc1) + (yc2 - yc1) * (yc2 - yc1) + eps

    # ---- center distance ----
    x_p = (x2 + x1) * 0.5
    y_p = (y2 + y1) * 0.5
    x_g = (x1g + x2g) * 0.5
    y_g = (y1g + y2g) * 0.5
    dx = x_p - x_g
    dy = y_p - y_g
    center_sq = dx * dx + dy * dy

    per_box = 1.0 - iou + center_sq * _fast_recip(diag_sq)  # (tr, 128)

    pid = pl.program_id(0)
    last = pl.num_programs(0) - 1

    def _fold(v):
        # vreg-aligned sublane-group fold: (tr,128) -> (tr//8, 8, 128) -> sum over
        # axis 0 is plain VALU vreg adds (no XLU reduce).
        return v.reshape(tr // 8, 8, _LANES).sum(axis=0)

    # Interior tiles: no padding, no mask, single fold.
    @pl.when(pid < last)
    def _():
        psum_ref[0] = _fold(per_box)

    # Last (ragged) tile: zero out the padded boxes before folding.
    @pl.when(pid == last)
    def _():
        row = lax.broadcasted_iota(jnp.int32, (tr, _LANES), 0)
        lane = lax.broadcasted_iota(jnp.int32, (tr, _LANES), 1)
        gidx = (pid * tr + row) * _LANES + lane  # global box index
        psum_ref[0] = _fold(jnp.where(gidx < n, per_box, 0.0))


@jax.jit
def diou_loss(output, target):
    """output, target: [N, 4] float boxes (x1, y1, x2, y2). Returns scalar mean DIoU loss."""
    assert output.shape == target.shape and output.shape[-1] == 4
    n = output.shape[0]
    assert n > 0

    rows = -(-n // _LANES)                              # cdiv(n, 128)
    tr = min(_MAX_TILE_ROWS, ((rows + 7) // 8) * 8)     # tile rows, multiple of 8
    r_pad = ((rows + tr - 1) // tr) * tr                # total rows, multiple of tr
    npad = r_pad * _LANES
    num_tiles = r_pad // tr

    def to_planar(b):
        b = jnp.pad(b.astype(jnp.float32), ((0, npad - n), (0, 0)))  # [npad, 4]
        return b.T.reshape(4, r_pad, _LANES)                         # coord-planar

    out_p = to_planar(output)
    tgt_p = to_planar(target)

    partials = pl.pallas_call(
        functools.partial(_diou_kernel, n=n, tr=tr),
        out_shape=jax.ShapeDtypeStruct((num_tiles, 8, _LANES), jnp.float32),
        grid_spec=pltpu.PrefetchScalarGridSpec(
            num_scalar_prefetch=0,
            grid=(num_tiles,),
            in_specs=[
                pl.BlockSpec((4, tr, _LANES), lambda i: (0, i, 0)),
                pl.BlockSpec((4, tr, _LANES), lambda i: (0, i, 0)),
            ],
            out_specs=pl.BlockSpec((1, 8, _LANES), lambda i: (i, 0, 0)),
        ),
        compiler_params=pltpu.CompilerParams(
            dimension_semantics=("parallel",),
            vmem_limit_bytes=32 * 1024 * 1024,
        ),
    )(out_p, tgt_p)

    return jnp.sum(partials) / jnp.float32(n)


def _diou_loss_ref(output, target):
    """Plain-JAX reference mirroring torchvision semantics, for validation."""
    eps = 1e-7
    x1, y1, x2, y2 = [output[:, i] for i in range(4)]
    x1g, y1g, x2g, y2g = [target[:, i] for i in range(4)]
    xkis1, ykis1 = jnp.maximum(x1, x1g), jnp.maximum(y1, y1g)
    xkis2, ykis2 = jnp.minimum(x2, x2g), jnp.minimum(y2, y2g)
    intsct = jnp.where((ykis2 > ykis1) & (xkis2 > xkis1),
                       (xkis2 - xkis1) * (ykis2 - ykis1), 0.0)
    union = (x2 - x1) * (y2 - y1) + (x2g - x1g) * (y2g - y1g) - intsct
    iou = intsct / (union + eps)
    diag = (jnp.maximum(x2, x2g) - jnp.minimum(x1, x1g)) ** 2 + \
           (jnp.maximum(y2, y2g) - jnp.minimum(y1, y1g)) ** 2 + eps
    cent = ((x2 + x1) / 2 - (x1g + x2g) / 2) ** 2 + ((y2 + y1) / 2 - (y1g + y2g) / 2) ** 2
    return jnp.mean(1.0 - iou + cent / diag)


if __name__ == "__main__":
    key = jax.random.PRNGKey(0)
    k1, k2, k3, k4 = jax.random.split(key, 4)
    N = 37  # small, non-multiple-of-128 box count to exercise last-tile masking

    # build valid boxes: x2 > x1, y2 > y1
    xy_pred = jax.random.uniform(k1, (N, 2), jnp.float32) * 10.0
    wh_pred = jax.random.uniform(k2, (N, 2), jnp.float32) * 5.0 + 0.1
    output = jnp.concatenate([xy_pred, xy_pred + wh_pred], axis=-1)  # [N, 4]

    xy_tgt = jax.random.uniform(k3, (N, 2), jnp.float32) * 10.0
    wh_tgt = jax.random.uniform(k4, (N, 2), jnp.float32) * 5.0 + 0.1
    target = jnp.concatenate([xy_tgt, xy_tgt + wh_tgt], axis=-1)  # [N, 4]

    loss = jax.block_until_ready(diou_loss(output, target))
    ref = jax.block_until_ready(_diou_loss_ref(output, target))
    assert jnp.allclose(loss, ref, rtol=1e-5, atol=1e-5), (loss, ref)
    print("KERNEL_OK")
</pallas_src>

<mosaic_0001>
module attributes {stable_mosaic.version = 11 : i64} {
  func.func @_diou_kernel(%arg0: i32, %arg1: memref<4x8x128xf32, #tpu.memory_space<vmem>>, %arg2: memref<4x8x128xf32, #tpu.memory_space<vmem>>, %arg3: memref<1x8x128xf32, #tpu.memory_space<vmem>>) attributes {dimension_semantics = [#tpu.dimension_semantics<parallel>], iteration_bounds = array<i64: 1>, scalar_prefetch = 0 : i64, scratch_operands = 0 : i64, tpu.core_type = #tpu.core_type<tc>, window_params = [{transform_indices = @transform_0, window_bounds = array<i64: 4, 8, 128>}, {transform_indices = @transform_1, window_bounds = array<i64: 4, 8, 128>}, {transform_indices = @transform_2, window_bounds = array<i64: 1, 8, 128>}]} {
    %c0 = arith.constant 0 : index
    %c0_0 = arith.constant 0 : index
    %c0_1 = arith.constant 0 : index
    %0 = vector.load %arg1[%c0, %c0_0, %c0_1] : memref<4x8x128xf32, #tpu.memory_space<vmem>>, vector<1x8x128xf32>
    %1 = vector.shape_cast %0 : vector<1x8x128xf32> to vector<8x128xf32>
    %c1 = arith.constant 1 : index
    %c0_2 = arith.constant 0 : index
    %c0_3 = arith.constant 0 : index
    %2 = vector.load %arg1[%c1, %c0_2, %c0_3] : memref<4x8x128xf32, #tpu.memory_space<vmem>>, vector<1x8x128xf32>
    %3 = vector.shape_cast %2 : vector<1x8x128xf32> to vector<8x128xf32>
    %c2 = arith.constant 2 : index
    %c0_4 = arith.constant 0 : index
    %c0_5 = arith.constant 0 : index
    %4 = vector.load %arg1[%c2, %c0_4, %c0_5] : memref<4x8x128xf32, #tpu.memory_space<vmem>>, vector<1x8x128xf32>
    %5 = vector.shape_cast %4 : vector<1x8x128xf32> to vector<8x128xf32>
    %c3 = arith.constant 3 : index
    %c0_6 = arith.constant 0 : index
    %c0_7 = arith.constant 0 : index
    %6 = vector.load %arg1[%c3, %c0_6, %c0_7] : memref<4x8x128xf32, #tpu.memory_space<vmem>>, vector<1x8x128xf32>
    %7 = vector.shape_cast %6 : vector<1x8x128xf32> to vector<8x128xf32>
    %c0_8 = arith.constant 0 : index
    %c0_9 = arith.constant 0 : index
    %c0_10 = arith.constant 0 : index
    %8 = vector.load %arg2[%c0_8, %c0_9, %c0_10] : memref<4x8x128xf32, #tpu.memory_space<vmem>>, vector<1x8x128xf32>
    %9 = vector.shape_cast %8 : vector<1x8x128xf32> to vector<8x128xf32>
    %c1_11 = arith.constant 1 : index
    %c0_12 = arith.constant 0 : index
    %c0_13 = arith.constant 0 : index
    %10 = vector.load %arg2[%c1_11, %c0_12, %c0_13] : memref<4x8x128xf32, #tpu.memory_space<vmem>>, vector<1x8x128xf32>
    %11 = vector.shape_cast %10 : vector<1x8x128xf32> to vector<8x128xf32>
    %c2_14 = arith.constant 2 : index
    %c0_15 = arith.constant 0 : index
    %c0_16 = arith.constant 0 : index
    %12 = vector.load %arg2[%c2_14, %c0_15, %c0_16] : memref<4x8x128xf32, #tpu.memory_space<vmem>>, vector<1x8x128xf32>
    %13 = vector.shape_cast %12 : vector<1x8x128xf32> to vector<8x128xf32>
    %c3_17 = arith.constant 3 : index
    %c0_18 = arith.constant 0 : index
    %c0_19 = arith.constant 0 : index
    %14 = vector.load %arg2[%c3_17, %c0_18, %c0_19] : memref<4x8x128xf32, #tpu.memory_space<vmem>>, vector<1x8x128xf32>
    %15 = vector.shape_cast %14 : vector<1x8x128xf32> to vector<8x128xf32>
    %16 = arith.maximumf %1, %9 : vector<8x128xf32>
    %17 = arith.maximumf %3, %11 : vector<8x128xf32>
    %18 = arith.minimumf %5, %13 : vector<8x128xf32>
    %19 = arith.minimumf %7, %15 : vector<8x128xf32>
    %20 = arith.cmpf ogt, %19, %17 : vector<8x128xf32>
    %21 = arith.cmpf ogt, %18, %16 : vector<8x128xf32>
    %22 = arith.andi %20, %21 : vector<8x128xi1>
    %23 = arith.subf %18, %16 : vector<8x128xf32>
    %24 = arith.subf %19, %17 : vector<8x128xf32>
    %25 = arith.mulf %23, %24 : vector<8x128xf32>
    %cst = arith.constant 0.000000e+00 : f32
    %26 = vector.broadcast %cst : f32 to vector<8x128xf32>
    %27 = arith.select %22, %25, %26 : vector<8x128xi1>, vector<8x128xf32>
    %28 = arith.subf %5, %1 : vector<8x128xf32>
    %29 = arith.subf %7, %3 : vector<8x128xf32>
    %30 = arith.mulf %28, %29 : vector<8x128xf32>
    %31 = arith.subf %13, %9 : vector<8x128xf32>
    %32 = arith.subf %15, %11 : vector<8x128xf32>
    %33 = arith.mulf %31, %32 : vector<8x128xf32>
    %34 = arith.addf %30, %33 : vector<8x128xf32>
    %35 = arith.subf %34, %27 : vector<8x128xf32>
    %cst_20 = arith.constant 1.000000e-07 : f32
    %36 = vector.broadcast %cst_20 : f32 to vector<8x128xf32>
    %37 = arith.addf %35, %36 : vector<8x128xf32>
    %38 = tpu.reciprocal %37 {approx = true} : vector<8x128xf32> -> vector<8x128xf32>
    %39 = arith.mulf %37, %38 : vector<8x128xf32>
    %cst_21 = arith.constant 2.000000e+00 : f32
    %40 = vector.broadcast %cst_21 : f32 to vector<8x128xf32>
    %41 = arith.subf %40, %39 : vector<8x128xf32>
    %42 = arith.mulf %38, %41 : vector<8x128xf32>
    %43 = arith.mulf %27, %42 : vector<8x128xf32>
    %44 = arith.minimumf %1, %9 : vector<8x128xf32>
    %45 = arith.minimumf %3, %11 : vector<8x128xf32>
    %46 = arith.maximumf %5, %13 : vector<8x128xf32>
    %47 = arith.maximumf %7, %15 : vector<8x128xf32>
    %48 = arith.subf %46, %44 : vector<8x128xf32>
    %49 = arith.subf %46, %44 : vector<8x128xf32>
    %50 = arith.mulf %48, %49 : vector<8x128xf32>
    %51 = arith.subf %47, %45 : vector<8x128xf32>
    %52 = arith.subf %47, %45 : vector<8x128xf32>
    %53 = arith.mulf %51, %52 : vector<8x128xf32>
    %54 = arith.addf %50, %53 : vector<8x128xf32>
    %cst_22 = arith.constant 1.000000e-07 : f32
    %55 = vector.broadcast %cst_22 : f32 to vector<8x128xf32>
    %56 = arith.addf %54, %55 : vector<8x128xf32>
    %57 = arith.addf %5, %1 : vector<8x128xf32>
    %cst_23 = arith.constant 5.000000e-01 : f32
    %58 = vector.broadcast %cst_23 : f32 to vector<8x128xf32>
    %59 = arith.mulf %57, %58 : vector<8x128xf32>
    %60 = arith.addf %7, %3 : vector<8x128xf32>
    %cst_24 = arith.constant 5.000000e-01 : f32
    %61 = vector.broadcast %cst_24 : f32 to vector<8x128xf32>
    %62 = arith.mulf %60, %61 : vector<8x128xf32>
    %63 = arith.addf %9, %13 : vector<8x128xf32>
    %cst_25 = arith.constant 5.000000e-01 : f32
    %64 = vector.broadcast %cst_25 : f32 to vector<8x128xf32>
    %65 = arith.mulf %63, %64 : vector<8x128xf32>
    %66 = arith.addf %11, %15 : vector<8x128xf32>
    %cst_26 = arith.constant 5.000000e-01 : f32
    %67 = vector.broadcast %cst_26 : f32 to vector<8x128xf32>
    %68 = arith.mulf %66, %67 : vector<8x128xf32>
    %69 = arith.subf %59, %65 : vector<8x128xf32>
    %70 = arith.subf %62, %68 : vector<8x128xf32>
    %71 = arith.mulf %69, %69 : vector<8x128xf32>
    %72 = arith.mulf %70, %70 : vector<8x128xf32>
    %73 = arith.addf %71, %72 : vector<8x128xf32>
    %cst_27 = arith.constant 1.000000e+00 : f32
    %74 = vector.broadcast %cst_27 : f32 to vector<8x128xf32>
    %75 = arith.subf %74, %43 : vector<8x128xf32>
    %76 = tpu.reciprocal %56 {approx = true} : vector<8x128xf32> -> vector<8x128xf32>
    %77 = arith.mulf %56, %76 : vector<8x128xf32>
    %cst_28 = arith.constant 2.000000e+00 : f32
    %78 = vector.broadcast %cst_28 : f32 to vector<8x128xf32>
    %79 = arith.subf %78, %77 : vector<8x128xf32>
    %80 = arith.mulf %76, %79 : vector<8x128xf32>
    %81 = arith.mulf %73, %80 : vector<8x128xf32>
    %82 = arith.addf %75, %81 : vector<8x128xf32>
    %c0_i32 = arith.constant 0 : i32
    %83 = arith.cmpi slt, %arg0, %c0_i32 : i32
    %84 = arith.extui %83 : i1 to i32
    %c0_i32_29 = arith.constant 0 : i32
    %85 = arith.cmpi ne, %84, %c0_i32_29 : i32
    scf.if %85 {
      %89 = vector.shape_cast %82 : vector<8x128xf32> to vector<1x8x128xf32>
      %cst_32 = arith.constant dense<0.000000e+00> : vector<8x128xf32>
      %90 = vector.multi_reduction <add>, %89, %cst_32 [0] : vector<1x8x128xf32> to vector<8x128xf32>
      %c0_33 = arith.constant 0 : index
      %c0_34 = arith.constant 0 : index
      %c0_35 = arith.constant 0 : index
      %91 = vector.load %arg3[%c0_33, %c0_34, %c0_35] : memref<1x8x128xf32, #tpu.memory_space<vmem>>, vector<1x8x128xf32>
      %92 = vector.shape_cast %91 : vector<1x8x128xf32> to vector<8x128xf32>
      %93 = vector.shape_cast %90 : vector<8x128xf32> to vector<1x8x128xf32>
      tpu.vector_store %arg3[%c0_33, %c0_34, %c0_35], %93 {strides = array<i32>} : memref<1x8x128xf32, #tpu.memory_space<vmem>>, vector<1x8x128xf32>,
    } else {
    }
    %c0_i32_30 = arith.constant 0 : i32
    %86 = arith.cmpi eq, %arg0, %c0_i32_30 : i32
    %87 = arith.extui %86 : i1 to i32
    %c0_i32_31 = arith.constant 0 : i32
    %88 = arith.cmpi ne, %87, %c0_i32_31 : i32
    scf.if %88 {
      %89 = tpu.iota {dimensions = array<i32: 0>} : vector<8x128xi32>
      %90 = tpu.iota {dimensions = array<i32: 1>} : vector<8x128xi32>
      %c8_i32 = arith.constant 8 : i32
      %91 = arith.muli %arg0, %c8_i32 : i32
      %92 = vector.broadcast %91 : i32 to vector<8x128xi32>
      %93 = arith.addi %92, %89 : vector<8x128xi32>
      %c128_i32 = arith.constant 128 : i32
      %94 = vector.broadcast %c128_i32 : i32 to vector<8x128xi32>
      %95 = arith.muli %93, %94 : vector<8x128xi32>
      %96 = arith.addi %95, %90 : vector<8x128xi32>
      %c37_i32 = arith.constant 37 : i32
      %97 = vector.broadcast %c37_i32 : i32 to vector<8x128xi32>
      %98 = arith.cmpi slt, %96, %97 : vector<8x128xi32>
      %cst_32 = arith.constant 0.000000e+00 : f32
      %99 = vector.broadcast %cst_32 : f32 to vector<8x128xf32>
      %100 = arith.select %98, %82, %99 : vector<8x128xi1>, vector<8x128xf32>
      %101 = vector.shape_cast %100 : vector<8x128xf32> to vector<1x8x128xf32>
      %cst_33 = arith.constant dense<0.000000e+00> : vector<8x128xf32>
      %102 = vector.multi_reduction <add>, %101, %cst_33 [0] : vector<1x8x128xf32> to vector<8x128xf32>
      %c0_34 = arith.constant 0 : index
      %c0_35 = arith.constant 0 : index
      %c0_36 = arith.constant 0 : index
      %103 = vector.load %arg3[%c0_34, %c0_35, %c0_36] : memref<1x8x128xf32, #tpu.memory_space<vmem>>, vector<1x8x128xf32>
      %104 = vector.shape_cast %103 : vector<1x8x128xf32> to vector<8x128xf32>
      %105 = vector.shape_cast %102 : vector<8x128xf32> to vector<1x8x128xf32>
      tpu.vector_store %arg3[%c0_34, %c0_35, %c0_36], %105 {strides = array<i32>} : memref<1x8x128xf32, #tpu.memory_space<vmem>>, vector<1x8x128xf32>,
    } else {
    }
    return
  }
  func.func @transform_0(%arg0: i32) -> (i32, i32, i32) {
    %c0_i32 = arith.constant 0 : i32
    %c0_i32_0 = arith.constant 0 : i32
    %c0_i32_1 = arith.constant 0 : i32
    return %c0_i32, %arg0, %c0_i32_0 : i32, i32, i32
  }
  func.func @transform_1(%arg0: i32) -> (i32, i32, i32) {
    %c0_i32 = arith.constant 0 : i32
    %c0_i32_0 = arith.constant 0 : i32
    %c0_i32_1 = arith.constant 0 : i32
    return %c0_i32, %arg0, %c0_i32_0 : i32, i32, i32
  }
  func.func @transform_2(%arg0: i32) -> (i32, i32, i32) {
    %c0_i32 = arith.constant 0 : i32
    %c0_i32_0 = arith.constant 0 : i32
    %c0_i32_1 = arith.constant 0 : i32
    return %arg0, %c0_i32, %c0_i32_0 : i32, i32, i32
  }
}

</mosaic_0001>

<bundles_post_ra>
// kernel: diou_loss.1
= control target key start
LH: loop header
LB: loop body
LE: loop exit
PB: predicated region body
PF: predicated region fallthrough
CT: control target
= control target key end

     0   :  { %v90_v43 = vlaneseq  ;;  %s159_s0 = inlined_call_operand.vmem [shape: f32[4,8,128], index: 0, kind: input, shape index: {}]   ;;  %s160_s1 = inlined_call_operand.vmem [shape: f32[4,8,128], index: 1, kind: input, shape index: {}]   ;;  %s161_s2 = inlined_call_operand.vmem [shape: f32[1,8,128], index: 2, kind: output, shape index: {}]  }
   0x1   :  { %v11_v0 = vld [vmem:[%s159_s0] sm:$0xff]  ;;  %v107_v1 = vld [vmem:[%s159_s0 + $0x8] sm:$0xff]  ;;  %v108_v2 = vld [vmem:[%s159_s0 + $0x10] sm:$0xff] }
   0x2   :  { %v109_v3 = vld [vmem:[%s159_s0 + $0x18] sm:$0xff]  ;;  %v18_v4 = vld [vmem:[%s160_s1] sm:$0xff]  ;;  %v110_v5 = vld [vmem:[%s160_s1 + $0x8] sm:$0xff]  ;;  %v36_v6 = vsub.f32 %v108_v2, %v11_v0  ;;  %v60_v33 = vadd.f32 %v108_v2, %v11_v0  ;;  %v91_v46 = vshrl.u32 %v90_v43, 7  ;;  %v93_v53 = vand.u32 127, %v90_v43 }
   0x3   :  { %v111_v7 = vld [vmem:[%s160_s1 + $0x10] sm:$0xff]  ;;  %v112_v8 = vld [vmem:[%s160_s1 + $0x18] sm:$0xff]  ;;  %v25_v9 = vmax.f32 %v11_v0, %v18_v4  ;;  %v26_v10 = vmax.f32 %v107_v1, %v110_v5  ;;  %v37_v11 = vsub.f32 %v109_v3, %v107_v1  ;;  %v50_v12 = vmin.f32 %v11_v0, %v18_v4 }
   0x4   :  { %v27_v13 = vmin.f32 %v108_v2, %v111_v7  ;;  %v28_v14 = vmin.f32 %v109_v3, %v112_v8  ;;  %v39_v15 = vsub.f32 %v111_v7, %v18_v4  ;;  %v40_v16 = vsub.f32 %v112_v8, %v110_v5 }
   0x5   :  { %v38_v17 = vmul.f32 %v37_v11, %v36_v6  ;;  %v51_v18 = vmin.f32 %v107_v1, %v110_v5  ;;  %v52_v19 = vmax.f32 %v108_v2, %v111_v7  ;;  %v53_v20 = vmax.f32 %v109_v3, %v112_v8 }
   0x6   :  { %vm29_vm0 = vcmp.gt.f32.partialorder %v28_v14, %v26_v10  ;;  %vm30_vm1 = vcmp.gt.f32.partialorder %v27_v13, %v25_v9  ;;  %v32_v21 = vsub.f32 %v27_v13, %v25_v9  ;;  %v33_v22 = vsub.f32 %v28_v14, %v26_v10 }
   0x7   :  { %vm31_vm2 = vmand %vm29_vm0, %vm30_vm1  ;;  %v41_v23 = vmul.f32 %v40_v16, %v39_v15  ;;  %v54_v24 = vsub.f32 %v52_v19, %v50_v12  ;;  %v56_v25 = vsub.f32 %v53_v20, %v51_v18  ;;  %v62_v34 = vadd.f32 %v109_v3, %v107_v1 }
   0x8   :  { %v34_v26 = vmul.f32 %v33_v22, %v32_v21  ;;  %v64_v37 = vadd.f32 %v111_v7, %v18_v4  ;;  %v66_v38 = vadd.f32 %v112_v8, %v110_v5  ;;  %v61_v39 = vmul.f32 0.5, %v60_v33 }
   0x9   :  { %v42_v27 = vadd.f32 %v41_v23, %v38_v17  ;;  %v55_v28 = vmul.f32 %v54_v24, %v54_v24  ;;  %v57_v29 = vmul.f32 %v56_v25, %v56_v25  ;;  %v63_v40 = vmul.f32 0.5, %v62_v34 }
   0xa   :  { %v35_v30 = vsel %vm31_vm2, %v34_v26, 0.0  ;;  %v65_v41 = vmul.f32 0.5, %v64_v37  ;;  %v67_v42 = vmul.f32 0.5, %v66_v38  ;;  %v97_v54 = vmul.u32 128, %v91_v46 }
   0xb   :  { %v43_v31 = vsub.f32 %v42_v27, %v35_v30  ;;  %v58_v32 = vadd.f32 %v57_v29, %v55_v28 }
   0xc   :  { %v68_v44 = vsub.f32 %v61_v39, %v65_v41  ;;  %v69_v45 = vsub.f32 %v63_v40, %v67_v42  ;;  %v98_v60 = vadd.s32 %v97_v54, %v93_v53 }
   0xd   :  { %v44_v35 = vadd.f32 1e-07, %v43_v31  ;;  %v59_v36 = vadd.f32 1e-07, %v58_v32 }
   0xe   :  { %v70_v48 = vmul.f32 %v68_v44, %v68_v44  ;;  %v71_v49 = vmul.f32 %v69_v45, %v69_v45  ;;  %vm99_vm3 = vcmp.lt.s32.totalorder %v98_v60, 37 }
   0xf   :  { %113 = vrcp.f32 %v44_v35 }
  0x10   :  { %115 = vrcp.f32 %v59_v36  ;;  %v72_v56 = vadd.f32 %v71_v49, %v70_v48 }
  0x19   :  { %v114_v47 = vpop.eup %113 }
  0x1a   :  { %v116_v50 = vpop.eup %115  ;;  %v46_v51 = vmul.f32 %v114_v47, %v44_v35 }
  0x1b   :  { %v75_v52 = vmul.f32 %v116_v50, %v59_v36 }
  0x1c   :  { %v47_v55 = vsub.f32 2.0, %v46_v51 }
  0x1d   :  { %v76_v57 = vsub.f32 2.0, %v75_v52 }
  0x1e   :  { %v48_v58 = vmul.f32 %v114_v47, %v47_v55 }
  0x1f   :  { %v77_v59 = vmul.f32 %v116_v50, %v76_v57 }
  0x20   :  { %v49_v61 = vmul.f32 %v48_v58, %v35_v30 }
  0x21   :  { %v78_v62 = vmul.f32 %v77_v59, %v72_v56 }
  0x22   :  { %v73_v63 = vsub.f32 1.0, %v49_v61 }
  0x24   :  { %v79_v0 = vadd.f32 %v78_v62, %v73_v63 }
  0x26   :  { %v100_v1 = vsel %vm99_vm3, %v79_v0, 0.0 }
  0x27   :  { %102 = vst [vmem:[%s161_s2] sm:$0xff] %v100_v1 }

</bundles_post_ra>
